<compile_context>
chip_gen: v5e
topology: v5e:2x2
jax: 0.10.0
libtpu: 0.0.40
codegen_flags: <defaults>
</compile_context>

<pallas_src>
import functools
import math

import jax
import jax.numpy as jnp
from jax.experimental import pallas as pl
from jax.experimental.pallas import tpu as pltpu


# --------------------------- fixed sin/cos table (pure JAX) ---------------------------

def get_fixed_sin_cos_encodings(d_model, max_len):
    assert d_model % 2 == 0
    position = jnp.arange(max_len, dtype=jnp.float32)[:, None]
    div_term = jnp.exp(jnp.arange(0, d_model, 2, dtype=jnp.float32)
                       * (-math.log(10000.0) / d_model))
    pe = jnp.zeros((max_len, d_model), jnp.float32)
    pe = pe.at[:, 0::2].set(jnp.sin(position * div_term))
    pe = pe.at[:, 1::2].set(jnp.cos(position * div_term))
    return pe


# ----------------------------------- Pallas kernel ------------------------------------

def _rel_pos_enc_kernel(t2_ref, jcol_ref, o_ref, *, p, d, cross_attn):
    """Produce one lane-dense (tq, tk*d) output block.

    t2_ref  : (R, tk*d)  f32, lane-tiled table rows: t2[r, j*d + c] = table[r, c]
    jcol_ref: (1, tk*d)  i32, jcol[0, j*d + c] = j (local key index per lane)
    o_ref   : (tq, tk*d) output block
    """
    tq_blk = o_ref.shape[0]
    tkd = o_ref.shape[1]
    tk_blk = tkd // d
    n_rows = t2_ref.shape[0]

    qi = pl.program_id(0)
    ki = pl.program_id(1)
    q0 = qi * tq_blk
    k0 = ki * tk_blk

    # Scalar min/max of the clamped table-row index over this whole block (scalar ALU).
    if cross_attn:
        d_min = q0 - (k0 + tk_blk - 1)
        d_max = (q0 + tq_blk - 1) - k0
        m_lo = jnp.clip(d_min, 0, p)
        m_hi = jnp.clip(d_max, 0, p)
    else:
        d_min = k0 - (q0 + tq_blk - 1)
        d_max = (k0 + tk_blk - 1) - q0
        m_lo = jnp.clip(d_min, -p, p) + p
        m_hi = jnp.clip(d_max, -p, p) + p

    is_const = m_lo == m_hi

    @pl.when(is_const)
    def _():
        # Whole block reads one table row: dynamic row load + sublane broadcast + store.
        row = t2_ref[pl.ds(m_lo, 1), :]                               # (1, tk*d) f32
        o_ref[...] = jnp.broadcast_to(row, o_ref.shape).astype(o_ref.dtype)

    @pl.when(jnp.logical_not(is_const))
    def _():
        # Diagonal-band block: lane-dense per-element row index, short select-gather.
        i_glob = q0 + jax.lax.broadcasted_iota(jnp.int32, (tq_blk, 1), 0)   # (tq, 1)
        j_glob = k0 + jcol_ref[...]                                         # (1, tk*d)
        if cross_attn:
            m2 = jnp.clip(i_glob - j_glob, 0, p)                            # (tq, tk*d)
        else:
            m2 = jnp.clip(j_glob - i_glob, -p, p) + p
        acc = jnp.broadcast_to(t2_ref[0:1, :], (tq_blk, tkd))
        for r in range(1, n_rows):            # R = 2P+1 (or P+1): small, unrolled
            acc = jnp.where(m2 == r, t2_ref[r:r + 1, :], acc)
        o_ref[...] = acc.astype(o_ref.dtype)


# ------------------------------------ host helpers ------------------------------------

def _tpu_vmem_capacity_bytes(default=64 << 20):
    try:
        return int(pltpu.get_tpu_info().vmem_capacity_bytes)
    except Exception:
        return default


def _num_tensorcores():
    try:
        info = pltpu.get_tpu_info()
    except Exception:
        return 1
    for name in ("num_tensorcores", "tensorcore_count", "num_cores", "core_count"):
        v = getattr(info, name, None)
        if isinstance(v, int) and v > 0:
            return v
    return 1


def _choose_tiles(length_q, length_k, d_model, num_rows, bytes_per_elem,
                  target_block_bytes, t2_budget_bytes=2 << 20):
    """Pick (tq, tk) for lane-dense (tq, tk*d) blocks obeying the (8, 128) rule."""
    lane_q = 128 // math.gcd(d_model, 128)      # tk granularity so (tk*d) % 128 == 0
    row_bytes = d_model * bytes_per_elem        # output bytes per key position
    row_bytes_f32 = d_model * 4                 # resident lane-tiled table stays f32

    # Lane extent: as wide as possible while (a) >= 8 sublane rows still fit in the
    # target block and (b) the resident lane-tiled table stays within its budget.
    max_tk = max(lane_q, (target_block_bytes // 8) // row_bytes)
    max_tk = min(max_tk, max(lane_q, t2_budget_bytes // (num_rows * row_bytes_f32)))
    if length_k <= max_tk:
        tk = length_k                           # full key dim -> always layout-legal
    else:
        tk = max(lane_q, (max_tk // lane_q) * lane_q)

    max_rows = max(1, target_block_bytes // (tk * row_bytes))
    if max_rows >= length_q or length_q <= 8:
        tq = length_q                           # full dim -> always layout-legal
    else:
        tq = max(8, (max_rows // 8) * 8)
    return int(tq), int(tk)


def unaligned_relative_positional_encoding(length_q, length_k, max_relative_position,
                                           d_model, *, cross_attn=False,
                                           embeddings_table=None,
                                           dtype=jnp.float32,
                                           target_block_bytes=None):
    """Pallas equivalent of UnalignedRelativePositionalEncoding(...).forward(Lq, Lk).

    Returns (length_q, length_k, d_model).  Pass `embeddings_table` (num_embeddings, d)
    to cover the trainable=True variant; by default the fixed sin/cos buffer is used.
    """
    assert d_model % 2 == 0
    p = int(max_relative_position)
    if cross_attn:
        assert length_q == length_k, "cross_attn path requires length_q == length_k"
    num_rows = (p + 1) if cross_attn else (2 * p + 1)   # rows the clamped index can hit

    if embeddings_table is None:
        table = get_fixed_sin_cos_encodings(d_model, 2 * p + 1)
    else:
        table = jnp.asarray(embeddings_table, jnp.float32)
        assert table.shape[0] >= num_rows and table.shape[1] == d_model
    table = table[:num_rows].astype(jnp.float32)

    vmem_cap = _tpu_vmem_capacity_bytes()
    if target_block_bytes is None:
        # Bigger blocks amortize per-step overhead on v5e/v6e (128 MiB VMEM);
        # stay modest on v7x (64 MiB VMEM per TensorCore).
        target_block_bytes = (8 << 20) if vmem_cap >= (100 << 20) else (4 << 20)

    bytes_per_elem = jnp.dtype(dtype).itemsize
    tq, tk = _choose_tiles(length_q, length_k, d_model, num_rows, bytes_per_elem,
                           target_block_bytes)

    # Only force a second grid step (for the second TensorCore) on multi-TC chips and
    # when the whole output would otherwise be a single block; never makes tq illegal.
    if (_num_tensorcores() >= 2
            and pl.cdiv(length_q, tq) * pl.cdiv(length_k, tk) < 2
            and length_q >= 16 and (length_q // 2) % 8 == 0):
        tq = length_q // 2

    tkd = tk * d_model
    # Resident inputs (fetched once; index_map is constant):
    #   t2[r, j*d + c] = table[r, c]      jcol[0, j*d + c] = j
    t2 = jnp.tile(table, (1, tk))                                          # (R, tk*d) f32
    jcol = jnp.repeat(jnp.arange(tk, dtype=jnp.int32), d_model)[None, :]   # (1, tk*d) i32

    block_bytes = tq * tkd * bytes_per_elem
    t2_bytes = num_rows * tkd * 4
    vmem_limit = int(min(vmem_cap * 3 // 4,
                         max(32 << 20, 12 * block_bytes + t2_bytes)))

    kernel = functools.partial(_rel_pos_enc_kernel, p=p, d=d_model,
                               cross_attn=cross_attn)
    grid = (pl.cdiv(length_q, tq), pl.cdiv(length_k, tk))

    out2d = pl.pallas_call(
        kernel,
        out_shape=jax.ShapeDtypeStruct((length_q, length_k * d_model), dtype),
        grid=grid,
        in_specs=[
            pl.BlockSpec((num_rows, tkd), lambda qi, ki: (0, 0)),   # resident table
            pl.BlockSpec((1, tkd), lambda qi, ki: (0, 0)),          # resident lane->key map
        ],
        out_specs=pl.BlockSpec((tq, tkd), lambda qi, ki: (qi, ki)),
        compiler_params=pltpu.CompilerParams(
            dimension_semantics=("parallel", "parallel"),
            vmem_limit_bytes=vmem_limit),
    )(t2, jcol)
    return out2d.reshape(length_q, length_k, d_model)


# ---------------- pure-JAX reference (mirrors the PyTorch module) ----------------

def _reference_forward(length_q, length_k, max_relative_position, d_model,
                       cross_attn=False, embeddings_table=None):
    p = max_relative_position
    table = (get_fixed_sin_cos_encodings(d_model, 2 * p + 1)
             if embeddings_table is None else jnp.asarray(embeddings_table, jnp.float32))
    if cross_attn:
        assert length_q == length_k
        dist = (jnp.arange(length_k - 1, -1, -1)[None, :]
                + jnp.arange(length_q)[:, None] - (length_q - 1))
        dist = jnp.maximum(dist, 0)
        idx = jnp.clip(dist, -p, p)
    else:
        dist = jnp.arange(length_k)[None, :] - jnp.arange(length_q)[:, None]
        idx = jnp.clip(dist, -p, p) + p
    return table[idx]


if __name__ == "__main__":
    max_relative_position = 4
    d_model = 32

    # The module's forward only consumes (length_q, length_k); build small dummy
    # hidden-state tensors deterministically and take the lengths from their shapes.
    kq, kk, kt = jax.random.split(jax.random.PRNGKey(0), 3)
    x_q = jax.random.normal(kq, (2, 12, d_model), dtype=jnp.float32)
    x_k = jax.random.normal(kk, (2, 16, d_model), dtype=jnp.float32)
    length_q, length_k = x_q.shape[1], x_k.shape[1]

    # --- self-attention path (cross_attn=False), fixed sin/cos table ---
    out = jax.block_until_ready(unaligned_relative_positional_encoding(
        length_q, length_k, max_relative_position, d_model, cross_attn=False))
    ref = _reference_forward(length_q, length_k, max_relative_position, d_model)
    assert out.shape == (length_q, length_k, d_model)
    assert jnp.allclose(out, ref, atol=1e-5, rtol=1e-5)

    # --- cross-attention path (requires Lq == Lk) ---
    out_x = jax.block_until_ready(unaligned_relative_positional_encoding(
        length_q, length_q, max_relative_position, d_model, cross_attn=True))
    ref_x = _reference_forward(length_q, length_q, max_relative_position, d_model,
                               cross_attn=True)
    assert jnp.allclose(out_x, ref_x, atol=1e-5, rtol=1e-5)

    # --- larger shape with a tiny block target: exercises the multi-block grid,
    #     the constant-block broadcast fast path, and partial edge blocks ---
    out_l = jax.block_until_ready(unaligned_relative_positional_encoding(
        60, 64, max_relative_position, d_model, cross_attn=False,
        target_block_bytes=4096))
    ref_l = _reference_forward(60, 64, max_relative_position, d_model)
    assert jnp.allclose(out_l, ref_l, atol=1e-5, rtol=1e-5)

    # --- bf16 output knob (halves HBM writeback on a write-bound kernel) ---
    out_bf = jax.block_until_ready(unaligned_relative_positional_encoding(
        length_q, length_k, max_relative_position, d_model, dtype=jnp.bfloat16))
    assert jnp.allclose(out_bf.astype(jnp.float32), ref, atol=2e-2, rtol=2e-2)

    # --- trainable=True variant: embedding weight passed as the table ---
    w = jax.random.normal(kt, (2 * max_relative_position + 1, d_model), jnp.float32)
    out_t = jax.block_until_ready(unaligned_relative_positional_encoding(
        length_q, length_k, max_relative_position, d_model, embeddings_table=w))
    ref_t = _reference_forward(length_q, length_k, max_relative_position, d_model,
                               embeddings_table=w)
    assert jnp.allclose(out_t, ref_t, atol=1e-5, rtol=1e-5)

    print("KERNEL_OK")
</pallas_src>

<mosaic_0001>
module attributes {stable_mosaic.version = 11 : i64} {
  func.func @_rel_pos_enc_kernel(%arg0: i32, %arg1: i32, %arg2: memref<9x512xf32, #tpu.memory_space<vmem>>, %arg3: memref<1x512xi32, #tpu.memory_space<vmem>>, %arg4: memref<12x512xf32, #tpu.memory_space<vmem>>) attributes {dimension_semantics = [#tpu.dimension_semantics<parallel>, #tpu.dimension_semantics<parallel>], iteration_bounds = array<i64: 1, 1>, scalar_prefetch = 0 : i64, scratch_operands = 0 : i64, tpu.core_type = #tpu.core_type<tc>, window_params = [{pipeline_mode = #tpu.pipeline_mode<synchronous>, transform_indices = @transform_0, window_bounds = array<i64: 9, 512>}, {pipeline_mode = #tpu.pipeline_mode<synchronous>, transform_indices = @transform_1, window_bounds = array<i64: 1, 512>}, {transform_indices = @transform_2, window_bounds = array<i64: 12, 512>}]} {
    %c12_i32 = arith.constant 12 : i32
    %0 = arith.muli %arg0, %c12_i32 : i32
    %c16_i32 = arith.constant 16 : i32
    %1 = arith.muli %arg1, %c16_i32 : i32
    %c12_i32_0 = arith.constant 12 : i32
    %2 = arith.addi %0, %c12_i32_0 : i32
    %c1_i32 = arith.constant 1 : i32
    %3 = arith.subi %2, %c1_i32 : i32
    %4 = arith.subi %1, %3 : i32
    %c16_i32_1 = arith.constant 16 : i32
    %5 = arith.addi %1, %c16_i32_1 : i32
    %c1_i32_2 = arith.constant 1 : i32
    %6 = arith.subi %5, %c1_i32_2 : i32
    %7 = arith.subi %6, %0 : i32
    %c-4_i32 = arith.constant -4 : i32
    %c4_i32 = arith.constant 4 : i32
    %8 = arith.maxsi %c-4_i32, %4 : i32
    %9 = arith.minsi %c4_i32, %8 : i32
    %c4_i32_3 = arith.constant 4 : i32
    %10 = arith.addi %9, %c4_i32_3 : i32
    %c-4_i32_4 = arith.constant -4 : i32
    %c4_i32_5 = arith.constant 4 : i32
    %11 = arith.maxsi %c-4_i32_4, %7 : i32
    %12 = arith.minsi %c4_i32_5, %11 : i32
    %c4_i32_6 = arith.constant 4 : i32
    %13 = arith.addi %12, %c4_i32_6 : i32
    %14 = arith.cmpi eq, %10, %13 : i32
    %15 = arith.extui %14 : i1 to i32
    %c0_i32 = arith.constant 0 : i32
    %16 = arith.cmpi ne, %15, %c0_i32 : i32
    scf.if %16 {
      %20 = arith.index_cast %10 : i32 to index
      %c0 = arith.constant 0 : index
      %21 = vector.load %arg2[%20, %c0] : memref<9x512xf32, #tpu.memory_space<vmem>>, vector<1x512xf32>
      %22 = vector.shape_cast %21 : vector<1x512xf32> to vector<1x512xf32>
      %23 = vector.broadcast %22 : vector<1x512xf32> to vector<12x512xf32>
      %c0_8 = arith.constant 0 : index
      %c0_9 = arith.constant 0 : index
      %24 = vector.load %arg4[%c0_8, %c0_9] : memref<12x512xf32, #tpu.memory_space<vmem>>, vector<12x512xf32>
      tpu.vector_store %arg4[%c0_8, %c0_9], %23 {strides = array<i32>} : memref<12x512xf32, #tpu.memory_space<vmem>>, vector<12x512xf32>,
    } else {
    }
    %true = arith.constant true
    %17 = arith.xori %14, %true : i1
    %18 = arith.extui %17 : i1 to i32
    %c0_i32_7 = arith.constant 0 : i32
    %19 = arith.cmpi ne, %18, %c0_i32_7 : i32
    scf.if %19 {
      %20 = tpu.iota {dimensions = array<i32: 0>} : vector<12x1xi32>
      %21 = vector.broadcast %0 : i32 to vector<12x1xi32>
      %22 = arith.addi %21, %20 : vector<12x1xi32>
      %c0 = arith.constant 0 : index
      %c0_8 = arith.constant 0 : index
      %23 = vector.load %arg3[%c0, %c0_8] : memref<1x512xi32, #tpu.memory_space<vmem>>, vector<1x512xi32>
      %24 = vector.broadcast %1 : i32 to vector<1x512xi32>
      %25 = arith.addi %24, %23 : vector<1x512xi32>
      %26 = vector.broadcast %25 : vector<1x512xi32> to vector<12x512xi32>
      %27 = vector.broadcast %22 : vector<12x1xi32> to vector<12x512xi32>
      %28 = arith.subi %26, %27 : vector<12x512xi32>
      %c-4_i32_9 = arith.constant -4 : i32
      %c4_i32_10 = arith.constant 4 : i32
      %29 = vector.broadcast %c-4_i32_9 : i32 to vector<12x512xi32>
      %30 = arith.maxsi %29, %28 : vector<12x512xi32>
      %31 = vector.broadcast %c4_i32_10 : i32 to vector<12x512xi32>
      %32 = arith.minsi %31, %30 : vector<12x512xi32>
      %c4_i32_11 = arith.constant 4 : i32
      %33 = vector.broadcast %c4_i32_11 : i32 to vector<12x512xi32>
      %34 = arith.addi %32, %33 : vector<12x512xi32>
      %c0_12 = arith.constant 0 : index
      %c0_13 = arith.constant 0 : index
      %35 = vector.load %arg2[%c0_12, %c0_13] : memref<9x512xf32, #tpu.memory_space<vmem>>, vector<1x512xf32>
      %36 = vector.shape_cast %35 : vector<1x512xf32> to vector<1x512xf32>
      %37 = vector.broadcast %36 : vector<1x512xf32> to vector<12x512xf32>
      %c1_i32_14 = arith.constant 1 : i32
      %38 = vector.broadcast %c1_i32_14 : i32 to vector<12x512xi32>
      %39 = arith.cmpi eq, %34, %38 : vector<12x512xi32>
      %c1 = arith.constant 1 : index
      %c0_15 = arith.constant 0 : index
      %40 = vector.load %arg2[%c1, %c0_15] : memref<9x512xf32, #tpu.memory_space<vmem>>, vector<1x512xf32>
      %41 = vector.shape_cast %40 : vector<1x512xf32> to vector<1x512xf32>
      %42 = vector.broadcast %41 : vector<1x512xf32> to vector<12x512xf32>
      %43 = arith.select %39, %42, %37 : vector<12x512xi1>, vector<12x512xf32>
      %c2_i32 = arith.constant 2 : i32
      %44 = vector.broadcast %c2_i32 : i32 to vector<12x512xi32>
      %45 = arith.cmpi eq, %34, %44 : vector<12x512xi32>
      %c2 = arith.constant 2 : index
      %c0_16 = arith.constant 0 : index
      %46 = vector.load %arg2[%c2, %c0_16] : memref<9x512xf32, #tpu.memory_space<vmem>>, vector<1x512xf32>
      %47 = vector.shape_cast %46 : vector<1x512xf32> to vector<1x512xf32>
      %48 = vector.broadcast %47 : vector<1x512xf32> to vector<12x512xf32>
      %49 = arith.select %45, %48, %43 : vector<12x512xi1>, vector<12x512xf32>
      %c3_i32 = arith.constant 3 : i32
      %50 = vector.broadcast %c3_i32 : i32 to vector<12x512xi32>
      %51 = arith.cmpi eq, %34, %50 : vector<12x512xi32>
      %c3 = arith.constant 3 : index
      %c0_17 = arith.constant 0 : index
      %52 = vector.load %arg2[%c3, %c0_17] : memref<9x512xf32, #tpu.memory_space<vmem>>, vector<1x512xf32>
      %53 = vector.shape_cast %52 : vector<1x512xf32> to vector<1x512xf32>
      %54 = vector.broadcast %53 : vector<1x512xf32> to vector<12x512xf32>
      %55 = arith.select %51, %54, %49 : vector<12x512xi1>, vector<12x512xf32>
      %c4_i32_18 = arith.constant 4 : i32
      %56 = vector.broadcast %c4_i32_18 : i32 to vector<12x512xi32>
      %57 = arith.cmpi eq, %34, %56 : vector<12x512xi32>
      %c4 = arith.constant 4 : index
      %c0_19 = arith.constant 0 : index
      %58 = vector.load %arg2[%c4, %c0_19] : memref<9x512xf32, #tpu.memory_space<vmem>>, vector<1x512xf32>
      %59 = vector.shape_cast %58 : vector<1x512xf32> to vector<1x512xf32>
      %60 = vector.broadcast %59 : vector<1x512xf32> to vector<12x512xf32>
      %61 = arith.select %57, %60, %55 : vector<12x512xi1>, vector<12x512xf32>
      %c5_i32 = arith.constant 5 : i32
      %62 = vector.broadcast %c5_i32 : i32 to vector<12x512xi32>
      %63 = arith.cmpi eq, %34, %62 : vector<12x512xi32>
      %c5 = arith.constant 5 : index
      %c0_20 = arith.constant 0 : index
      %64 = vector.load %arg2[%c5, %c0_20] : memref<9x512xf32, #tpu.memory_space<vmem>>, vector<1x512xf32>
      %65 = vector.shape_cast %64 : vector<1x512xf32> to vector<1x512xf32>
      %66 = vector.broadcast %65 : vector<1x512xf32> to vector<12x512xf32>
      %67 = arith.select %63, %66, %61 : vector<12x512xi1>, vector<12x512xf32>
      %c6_i32 = arith.constant 6 : i32
      %68 = vector.broadcast %c6_i32 : i32 to vector<12x512xi32>
      %69 = arith.cmpi eq, %34, %68 : vector<12x512xi32>
      %c6 = arith.constant 6 : index
      %c0_21 = arith.constant 0 : index
      %70 = vector.load %arg2[%c6, %c0_21] : memref<9x512xf32, #tpu.memory_space<vmem>>, vector<1x512xf32>
      %71 = vector.shape_cast %70 : vector<1x512xf32> to vector<1x512xf32>
      %72 = vector.broadcast %71 : vector<1x512xf32> to vector<12x512xf32>
      %73 = arith.select %69, %72, %67 : vector<12x512xi1>, vector<12x512xf32>
      %c7_i32 = arith.constant 7 : i32
      %74 = vector.broadcast %c7_i32 : i32 to vector<12x512xi32>
      %75 = arith.cmpi eq, %34, %74 : vector<12x512xi32>
      %c7 = arith.constant 7 : index
      %c0_22 = arith.constant 0 : index
      %76 = vector.load %arg2[%c7, %c0_22] : memref<9x512xf32, #tpu.memory_space<vmem>>, vector<1x512xf32>
      %77 = vector.shape_cast %76 : vector<1x512xf32> to vector<1x512xf32>
      %78 = vector.broadcast %77 : vector<1x512xf32> to vector<12x512xf32>
      %79 = arith.select %75, %78, %73 : vector<12x512xi1>, vector<12x512xf32>
      %c8_i32 = arith.constant 8 : i32
      %80 = vector.broadcast %c8_i32 : i32 to vector<12x512xi32>
      %81 = arith.cmpi eq, %34, %80 : vector<12x512xi32>
      %c8 = arith.constant 8 : index
      %c0_23 = arith.constant 0 : index
      %82 = vector.load %arg2[%c8, %c0_23] : memref<9x512xf32, #tpu.memory_space<vmem>>, vector<1x512xf32>
      %83 = vector.shape_cast %82 : vector<1x512xf32> to vector<1x512xf32>
      %84 = vector.broadcast %83 : vector<1x512xf32> to vector<12x512xf32>
      %85 = arith.select %81, %84, %79 : vector<12x512xi1>, vector<12x512xf32>
      %c0_24 = arith.constant 0 : index
      %c0_25 = arith.constant 0 : index
      %86 = vector.load %arg4[%c0_24, %c0_25] : memref<12x512xf32, #tpu.memory_space<vmem>>, vector<12x512xf32>
      tpu.vector_store %arg4[%c0_24, %c0_25], %85 {strides = array<i32>} : memref<12x512xf32, #tpu.memory_space<vmem>>, vector<12x512xf32>,
    } else {
    }
    return
  }
  func.func @transform_0(%arg0: i32, %arg1: i32) -> (i32, i32) {
    %c0_i32 = arith.constant 0 : i32
    %c0_i32_0 = arith.constant 0 : i32
    %c0_i32_1 = arith.constant 0 : i32
    return %c0_i32, %c0_i32_0 : i32, i32
  }
  func.func @transform_1(%arg0: i32, %arg1: i32) -> (i32, i32) {
    %c0_i32 = arith.constant 0 : i32
    %c0_i32_0 = arith.constant 0 : i32
    %c0_i32_1 = arith.constant 0 : i32
    return %c0_i32, %c0_i32_0 : i32, i32
  }
  func.func @transform_2(%arg0: i32, %arg1: i32) -> (i32, i32) {
    %c0_i32 = arith.constant 0 : i32
    return %arg0, %arg1 : i32, i32
  }
}

</mosaic_0001>

<bundles_post_ra>
// kernel: tpu_custom_call.1
= control target key start
LH: loop header
LB: loop body
LE: loop exit
PB: predicated region body
PF: predicated region fallthrough
CT: control target
= control target key end

     0   :  { %7 = vsyncpa [#allocation3], 0  ;;  %s768_s0 = inlined_call_operand.hbm [shape: f32[9,512], index: 0, kind: input, shape index: {}]   ;;  %s769_s1 = inlined_call_operand.hbm [shape: s32[1,512], index: 1, kind: input, shape index: {}]   ;;  %s770_s2 = inlined_call_operand.hbm [shape: f32[12,512], index: 2, kind: output, shape index: {}]  }
   0x1   :  { %8 = vsyncpa [#allocation6], 0 }
   0x2   :  { %9 = vsyncpa [#allocation4], 0  ;;  %s14_s11 = sshll.u32 %s768_s0, 4  ;;  %s493_s12 = smov [#allocation2]   ;;  %s15_s11 = int_to_ptr.hbm [resolvable:$true] %s14_s11 }
   0x3   :  { %s16_s13 = sshll.u32 %s493_s12, 4  ;;  %s28_s16 = sshll.u32 %s769_s1, 4  ;;  %s17_s13 = int_to_ptr.vmem [resolvable:$true] %s16_s13  ;;  %s29_s16 = int_to_ptr.hbm [resolvable:$true] %s28_s16 }
   0x4   :  { %s494_s17 = smov 512   ;;  %s495_s18 = smov 32  }
   0x5   :  { %22 = dma.hbm_to_vmem [thread:$0]  %s15_s11, 1024, %s17_s13, [#allocation3], %s494_s17, %s494_s17, %s495_s18  }
   0x6   :  { %s496_s19 = smov [#allocation5]  }
   0x7   :  { %s30_s20 = sshll.u32 %s496_s19, 4  ;;  %s31_s20 = int_to_ptr.vmem [resolvable:$true] %s30_s20 }
   0x8   :  { %33 = dma.hbm_to_vmem [thread:$0]  %s29_s16, 64, %s31_s20, [#allocation6]  }
   0x9   :  { %487 = dma.done.wait [#allocation3], 1024  }
   0xa   :  { %488 = vsyncadd [#allocation3], 4294966272 }
   0xb   :  { %489 = dma.done.wait [#allocation6], 64  }
   0xc   :  { %490 = vsyncadd [#allocation6], 4294967232  ;;  %v92_v0 = vlaneseq  ;;  %v524_v2 = vld [vmem:[#allocation5] sm:$0xf]  ;;  %s497_s0 = smov [#allocation7]   ;;  %s393_s23 = sshll.u32 %s770_s2, 4  ;;  %s394_s23 = int_to_ptr.hbm [resolvable:$true] %s393_s23 }
   0xd   :  { %v526_v3 = vld [vmem:[#allocation2] ss:$8 sm:$0xf]  ;;  %v101_v4 = vperm.slane %v524_v2, 0  ;;  %v102_v6 = vperm.slane %v524_v2, 1  ;;  %v103_v20 = vperm.slane %v524_v2, 2 }
   0xe   :  { %v522_v1 = vshrl.u32 %v92_v0, 7  ;;  %v529_v5 = vld [vmem:[#allocation2 + $0x1] ss:$8 sm:$0xf]  ;;  %v155_v8 = vperm.slane %v526_v3, 0  ;;  %v156_v11 = vperm.slane %v526_v3, 1 }
   0xf   :  { %v174_v9 = vperm.slane %v529_v5, 0  ;;  %v537_v10 = vld [vmem:[#allocation2 + $0x2] ss:$8 sm:$0xf]  ;;  %v175_v16 = vperm.slane %v529_v5, 1  ;;  %v157_v59 = vperm.slane %v526_v3, 2 }
  0x10   :  { %v533_v7 = vadd.s32 8, %v522_v1  ;;  %v105_v12 = vsub.s32 %v101_v4, %v522_v1  ;;  %v201_v13 = vperm.slane %v537_v10, 0  ;;  %v542_v14 = vld [vmem:[#allocation2 + $0x3] ss:$8 sm:$0xf]  ;;  %v106_v15 = vsub.s32 %v102_v6, %v522_v1  ;;  %s391_s1 = sshll.u32 %s497_s0, 4  ;;  %s392_s1 = int_to_ptr.vmem [resolvable:$true] %s391_s1 }
  0x11   :  { %v228_v17 = vperm.slane %v542_v14, 0  ;;  %v547_v18 = vld [vmem:[#allocation2 + $0x4] ss:$8 sm:$0xf]  ;;  %v202_v19 = vperm.slane %v537_v10, 1  ;;  %v229_v22 = vperm.slane %v542_v14, 1  ;;  %v107_v31 = vsub.s32 %v103_v20, %v522_v1 }
  0x12   :  { %vm113_vm0 = vcmp.gt.s32.totalorder %v105_v12, 4294967292  ;;  %v551_v21 = vld [vmem:[#allocation2 + $0x5] ss:$8 sm:$0xf]  ;;  %vm115_vm1 = vcmp.gt.s32.totalorder %v106_v15, 4294967292  ;;  %v555_v23 = vsub.s32 %v101_v4, %v533_v7  ;;  %v255_v25 = vperm.slane %v547_v18, 0 }
  0x13   :  { %v114_v24 = vsel %vm113_vm0, %v105_v12, 4294967292  ;;  %v558_v26 = vld [vmem:[#allocation2 + $0x6] ss:$8 sm:$0xf]  ;;  %v116_v27 = vsel %vm115_vm1, %v106_v15, 4294967292  ;;  %v561_v28 = vsub.s32 %v102_v6, %v533_v7  ;;  %v282_v29 = vperm.slane %v551_v21, 0 }
  0x14   :  { %vm129_vm2 = vcmp.lt.s32.totalorder %v114_v24, 4  ;;  %v564_v30 = vld [vmem:[#allocation2 + $0x7] ss:$8 sm:$0xf]  ;;  %vm131_vm3 = vcmp.lt.s32.totalorder %v116_v27, 4  ;;  %v309_v33 = vperm.slane %v558_v26, 0  ;;  %v571_v36 = vsub.s32 %v103_v20, %v533_v7 }
  0x15   :  { %v130_v32 = vsel %vm129_vm2, %v114_v24, 4  ;;  %v568_v34 = vld [vmem:[#allocation2 + $0x20] ss:$8 sm:$0xf]  ;;  %v132_v35 = vsel %vm131_vm3, %v116_v27, 4  ;;  %v336_v38 = vperm.slane %v564_v30, 0 }
  0x16   :  { %v145_v37 = vadd.s32 4, %v130_v32  ;;  %v363_v39 = vperm.slane %v568_v34, 0  ;;  %v146_v40 = vadd.s32 4, %v132_v35  ;;  %v256_v41 = vperm.slane %v547_v18, 1 }
  0x17   :  { %v283_v42 = vperm.slane %v551_v21, 1  ;;  %v310_v43 = vperm.slane %v558_v26, 1  ;;  %v337_v44 = vperm.slane %v564_v30, 1  ;;  %v364_v45 = vperm.slane %v568_v34, 1 }
  0x18   :  { %vm163_vm4 = vcmp.eq.s32.totalorder %v145_v37, 1  ;;  %vm190_vm5 = vcmp.eq.s32.totalorder %v145_v37, 2  ;;  %vm217_vm6 = vcmp.eq.s32.totalorder %v145_v37, 3  ;;  %vm244_vm7 = vcmp.eq.s32.totalorder %v145_v37, 4 }
  0x19   :  { %v182_v46 = vsel %vm163_vm4, %v174_v9, %v155_v8  ;;  %vm271_vm8 = vcmp.eq.s32.totalorder %v145_v37, 5  ;;  %vm298_vm9 = vcmp.eq.s32.totalorder %v145_v37, 6  ;;  %vm325_vm10 = vcmp.eq.s32.totalorder %v145_v37, 7 }
  0x1a   :  { %v209_v47 = vsel %vm190_vm5, %v201_v13, %v182_v46  ;;  %vm164_vm11 = vcmp.eq.s32.totalorder %v146_v40, 1  ;;  %vm191_vm12 = vcmp.eq.s32.totalorder %v146_v40, 2  ;;  %vm218_vm13 = vcmp.eq.s32.totalorder %v146_v40, 3 }
  0x1b   :  { %v236_v48 = vsel %vm217_vm6, %v228_v17, %v209_v47  ;;  %v183_v49 = vsel %vm164_vm11, %v175_v16, %v156_v11  ;;  %vm245_vm14 = vcmp.eq.s32.totalorder %v146_v40, 4  ;;  %vm352_vm15 = vcmp.eq.s32.totalorder %v145_v37, 8 }
  0x1c   :  { %v263_v50 = vsel %vm244_vm7, %v255_v25, %v236_v48  ;;  %v210_v51 = vsel %vm191_vm12, %v202_v19, %v183_v49  ;;  %vm272_vm0 = vcmp.eq.s32.totalorder %v146_v40, 5  ;;  %vm299_vm1 = vcmp.eq.s32.totalorder %v146_v40, 6 }
  0x1d   :  { %v290_v52 = vsel %vm271_vm8, %v282_v29, %v263_v50  ;;  %v237_v53 = vsel %vm218_vm13, %v229_v22, %v210_v51  ;;  %vm326_vm2 = vcmp.eq.s32.totalorder %v146_v40, 7  ;;  %vm353_vm3 = vcmp.eq.s32.totalorder %v146_v40, 8 }
  0x1e   :  { %v317_v54 = vsel %vm298_vm9, %v309_v33, %v290_v52  ;;  %v264_v55 = vsel %vm245_vm14, %v256_v41, %v237_v53  ;;  %vm117_vm4 = vcmp.gt.s32.totalorder %v107_v31, 4294967292  ;;  %v176_v62 = vperm.slane %v529_v5, 2 }
  0x1f   :  { %v344_v56 = vsel %vm325_vm10, %v336_v38, %v317_v54  ;;  %v291_v57 = vsel %vm272_vm0, %v283_v42, %v264_v55  ;;  %v118_v58 = vsel %vm117_vm4, %v107_v31, 4294967292  ;;  %v203_v4 = vperm.slane %v537_v10, 2 }
  0x20   :  { %v371_v60 = vsel %vm352_vm15, %v363_v39, %v344_v56  ;;  %v318_v61 = vsel %vm299_vm1, %v310_v43, %v291_v57  ;;  %vm133_vm5 = vcmp.lt.s32.totalorder %v118_v58, 4  ;;  %v230_v6 = vperm.slane %v542_v14, 2 }
  0x21   :  { %379 = vst [vmem:[#allocation7] sm:$0xff] %v371_v60  ;;  %v345_v63 = vsel %vm326_vm2, %v337_v44, %v318_v61  ;;  %v134_v0 = vsel %vm133_vm5, %v118_v58, 4  ;;  %v257_v20 = vperm.slane %v547_v18, 2  ;;  %v284_v24 = vperm.slane %v551_v21, 2 }
  0x22   :  { %v372_v12 = vsel %vm353_vm3, %v364_v45, %v345_v63  ;;  %v147_v15 = vadd.s32 4, %v134_v0  ;;  %v311_v27 = vperm.slane %v558_v26, 2  ;;  %v338_v31 = vperm.slane %v564_v30, 2 }
  0x23   :  { %380 = vst [vmem:[#allocation7 + $0x8] sm:$0xff] %v372_v12  ;;  %v365_v32 = vperm.slane %v568_v34, 2  ;;  %v104_v35 = vperm.slane %v524_v2, 3  ;;  %v158_v37 = vperm.slane %v526_v3, 3  ;;  %v177_v48 = vperm.slane %v529_v5, 3 }
  0x24   :  { %vm165_vm6 = vcmp.eq.s32.totalorder %v147_v15, 1  ;;  %vm192_vm7 = vcmp.eq.s32.totalorder %v147_v15, 2  ;;  %vm219_vm8 = vcmp.eq.s32.totalorder %v147_v15, 3  ;;  %vm246_vm9 = vcmp.eq.s32.totalorder %v147_v15, 4 }
  0x25   :  { %v184_v40 = vsel %vm165_vm6, %v176_v62, %v157_v59  ;;  %vm273_vm10 = vcmp.eq.s32.totalorder %v147_v15, 5  ;;  %vm300_vm11 = vcmp.eq.s32.totalorder %v147_v15, 6  ;;  %vm327_vm12 = vcmp.eq.s32.totalorder %v147_v15, 7 }
  0x26   :  { %v211_v46 = vsel %vm192_vm7, %v203_v4, %v184_v40  ;;  %vm354_vm13 = vcmp.eq.s32.totalorder %v147_v15, 8  ;;  %v108_v2 = vsub.s32 %v104_v35, %v522_v1  ;;  %v204_v49 = vperm.slane %v537_v10, 3 }
  0x27   :  { %v238_v47 = vsel %vm219_vm8, %v230_v6, %v211_v46  ;;  %v231_v50 = vperm.slane %v542_v14, 3  ;;  %v258_v52 = vperm.slane %v547_v18, 3  ;;  %v285_v53 = vperm.slane %v551_v21, 3 }
  0x28   :  { %v265_v51 = vsel %vm246_vm9, %v257_v20, %v238_v47  ;;  %vm119_vm14 = vcmp.gt.s32.totalorder %v108_v2, 4294967292  ;;  %v312_v55 = vperm.slane %v558_v26, 3  ;;  %v339_v56 = vperm.slane %v564_v30, 3 }
  0x29   :  { %v292_v1 = vsel %vm273_vm10, %v284_v24, %v265_v51  ;;  %v120_v54 = vsel %vm119_vm14, %v108_v2, 4294967292  ;;  %vm121_vm0 = vcmp.gt.s32.totalorder %v555_v23, 4294967292  ;;  %vm123_vm1 = vcmp.gt.s32.totalorder %v561_v28, 4294967292 }
  0x2a   :  { %v319_v57 = vsel %vm300_vm11, %v311_v27, %v292_v1  ;;  %vm135_vm15 = vcmp.lt.s32.totalorder %v120_v54, 4  ;;  %v122_v61 = vsel %vm121_vm0, %v555_v23, 4294967292  ;;  %v124_v63 = vsel %vm123_vm1, %v561_v28, 4294967292 }
  0x2b   :  { %v346_v58 = vsel %vm327_vm12, %v338_v31, %v319_v57  ;;  %v136_v60 = vsel %vm135_vm15, %v120_v54, 4  ;;  %vm137_vm2 = vcmp.lt.s32.totalorder %v122_v61, 4  ;;  %vm139_vm3 = vcmp.lt.s32.totalorder %v124_v63, 4 }
  0x2c   :  { %v373_v0 = vsel %vm354_vm13, %v365_v32, %v346_v58  ;;  %v148_v12 = vadd.s32 4, %v136_v60  ;;  %v366_v40 = vperm.slane %v568_v34, 3  ;;  %v138_v46 = vsel %vm137_vm2, %v122_v61, 4 }
  0x2d   :  { %381 = vst [vmem:[#allocation7 + $0x10] sm:$0xff] %v373_v0  ;;  %v140_v2 = vsel %vm139_vm3, %v124_v63, 4  ;;  %v112_v47 = vsub.s32 %v104_v35, %v533_v7  ;;  %vm125_vm7 = vcmp.gt.s32.totalorder %v571_v36, 4294967292  ;;  %v149_v15 = vadd.s32 4, %v138_v46 }
  0x2e   :  { %vm166_vm4 = vcmp.eq.s32.totalorder %v148_v12, 1  ;;  %vm193_vm5 = vcmp.eq.s32.totalorder %v148_v12, 2  ;;  %vm220_vm6 = vcmp.eq.s32.totalorder %v148_v12, 3  ;;  %vm247_vm8 = vcmp.eq.s32.totalorder %v148_v12, 4 }
  0x2f   :  { %v185_v23 = vsel %vm166_vm4, %v177_v48, %v158_v37  ;;  %vm274_vm9 = vcmp.eq.s32.totalorder %v148_v12, 5  ;;  %vm301_vm10 = vcmp.eq.s32.totalorder %v148_v12, 6  ;;  %vm328_vm11 = vcmp.eq.s32.totalorder %v148_v12, 7 }
  0x30   :  { %v212_v28 = vsel %vm193_vm5, %v204_v49, %v185_v23  ;;  %vm355_vm12 = vcmp.eq.s32.totalorder %v148_v12, 8  ;;  %v150_v35 = vadd.s32 4, %v140_v2  ;;  %v126_v51 = vsel %vm125_vm7, %v571_v36, 4294967292 }
  0x31   :  { %v239_v7 = vsel %vm220_vm6, %v231_v50, %v212_v28  ;;  %vm127_vm13 = vcmp.gt.s32.totalorder %v112_v47, 4294967292  ;;  %vm167_vm14 = vcmp.eq.s32.totalorder %v149_v15, 1  ;;  %vm194_vm15 = vcmp.eq.s32.totalorder %v149_v15, 2 }
  0x32   :  { %v266_v1 = vsel %vm247_vm8, %v258_v52, %v239_v7  ;;  %vm221_vm0 = vcmp.eq.s32.totalorder %v149_v15, 3  ;;  %v186_v57 = vsel %vm167_vm14, %v174_v9, %v155_v8  ;;  %vm248_vm1 = vcmp.eq.s32.totalorder %v149_v15, 4 }
  0x33   :  { %v293_v54 = vsel %vm274_vm9, %v285_v53, %v266_v1  ;;  %vm275_vm2 = vcmp.eq.s32.totalorder %v149_v15, 5  ;;  %v213_v58 = vsel %vm194_vm15, %v201_v13, %v186_v57  ;;  %vm302_vm3 = vcmp.eq.s32.totalorder %v149_v15, 6 }
  0x34   :  { %v320_v36 = vsel %vm301_vm10, %v312_v55, %v293_v54  ;;  %vm329_vm4 = vcmp.eq.s32.totalorder %v149_v15, 7  ;;  %v240_v61 = vsel %vm221_vm0, %v228_v17, %v213_v58  ;;  %vm356_vm5 = vcmp.eq.s32.totalorder %v149_v15, 8 }
  0x35   :  { %v347_v60 = vsel %vm328_vm11, %v339_v56, %v320_v36  ;;  %vm168_vm6 = vcmp.eq.s32.totalorder %v150_v35, 1  ;;  %v267_v9 = vsel %vm248_vm1, %v255_v25, %v240_v61  ;;  %vm195_vm7 = vcmp.eq.s32.totalorder %v150_v35, 2 }
  0x36   :  { %v374_v8 = vsel %vm355_vm12, %v366_v40, %v347_v60  ;;  %v187_v13 = vsel %vm168_vm6, %v175_v16, %v156_v11  ;;  %v294_v63 = vsel %vm275_vm2, %v282_v29, %v267_v9  ;;  %vm222_vm8 = vcmp.eq.s32.totalorder %v150_v35, 3 }
  0x37   :  { %382 = vst [vmem:[#allocation7 + $0x18] sm:$0xff] %v374_v8  ;;  %v214_v17 = vsel %vm195_vm7, %v202_v19, %v187_v13  ;;  %vm249_vm9 = vcmp.eq.s32.totalorder %v150_v35, 4  ;;  %v321_v0 = vsel %vm302_vm3, %v309_v33, %v294_v63  ;;  %vm276_vm10 = vcmp.eq.s32.totalorder %v150_v35, 5 }
  0x38   :  { %v241_v25 = vsel %vm222_vm8, %v229_v22, %v214_v17  ;;  %vm303_vm11 = vcmp.eq.s32.totalorder %v150_v35, 6  ;;  %v348_v11 = vsel %vm329_vm4, %v336_v38, %v321_v0  ;;  %vm330_vm12 = vcmp.eq.s32.totalorder %v150_v35, 7 }
  0x39   :  { %v268_v16 = vsel %vm249_vm9, %v256_v41, %v241_v25  ;;  %vm357_vm14 = vcmp.eq.s32.totalorder %v150_v35, 8  ;;  %v375_v19 = vsel %vm356_vm5, %v363_v39, %v348_v11  ;;  %vm141_vm15 = vcmp.lt.s32.totalorder %v126_v51, 4 }
  0x3a   :  { %v295_v29 = vsel %vm276_vm10, %v283_v42, %v268_v16  ;;  %v128_v22 = vsel %vm127_vm13, %v112_v47, 4294967292  ;;  %383 = vst [vmem:[#allocation7 + $0x20] sm:$0xf] %v375_v19  ;;  %v142_v38 = vsel %vm141_vm15, %v126_v51, 4 }
  0x3b   :  { %v322_v33 = vsel %vm303_vm11, %v310_v43, %v295_v29  ;;  %vm143_vm0 = vcmp.lt.s32.totalorder %v128_v22, 4  ;;  %v151_v12 = vadd.s32 4, %v142_v38 }
  0x3c   :  { %v349_v41 = vsel %vm330_vm12, %v337_v44, %v322_v33  ;;  %v144_v46 = vsel %vm143_vm0, %v128_v22, 4 }
  0x3d   :  { %v376_v39 = vsel %vm357_vm14, %v364_v45, %v349_v41  ;;  %v152_v2 = vadd.s32 4, %v144_v46  ;;  %vm169_vm1 = vcmp.eq.s32.totalorder %v151_v12, 1  ;;  %vm196_vm2 = vcmp.eq.s32.totalorder %v151_v12, 2 }
  0x3e   :  { %384 = vst [vmem:[#allocation7 + $0x28] sm:$0xf] %v376_v39  ;;  %vm223_vm3 = vcmp.eq.s32.totalorder %v151_v12, 3  ;;  %v188_v42 = vsel %vm169_vm1, %v176_v62, %v157_v59  ;;  %vm250_vm13 = vcmp.eq.s32.totalorder %v151_v12, 4  ;;  %vm277_vm4 = vcmp.eq.s32.totalorder %v151_v12, 5 }
  0x3f   :  { %v215_v43 = vsel %vm196_vm2, %v203_v4, %v188_v42  ;;  %vm304_vm5 = vcmp.eq.s32.totalorder %v151_v12, 6  ;;  %vm170_vm6 = vcmp.eq.s32.totalorder %v152_v2, 1  ;;  %vm197_vm7 = vcmp.eq.s32.totalorder %v152_v2, 2 }
  0x40   :  { %v242_v44 = vsel %vm223_vm3, %v230_v6, %v215_v43  ;;  %v189_v45 = vsel %vm170_vm6, %v177_v48, %v158_v37  ;;  %vm224_vm8 = vcmp.eq.s32.totalorder %v152_v2, 3  ;;  %vm251_vm9 = vcmp.eq.s32.totalorder %v152_v2, 4 }
  0x41   :  { %v269_v59 = vsel %vm250_vm13, %v257_v20, %v242_v44  ;;  %vm331_vm10 = vcmp.eq.s32.totalorder %v151_v12, 7  ;;  %v216_v62 = vsel %vm197_vm7, %v204_v49, %v189_v45  ;;  %vm278_vm11 = vcmp.eq.s32.totalorder %v152_v2, 5 }
  0x42   :  { %v296_v4 = vsel %vm277_vm4, %v284_v24, %v269_v59  ;;  %vm358_vm12 = vcmp.eq.s32.totalorder %v151_v12, 8  ;;  %v243_v3 = vsel %vm224_vm8, %v231_v50, %v216_v62  ;;  %vm305_vm14 = vcmp.eq.s32.totalorder %v152_v2, 6 }
  0x43   :  { %v323_v5 = vsel %vm304_vm5, %v311_v27, %v296_v4  ;;  %v270_v6 = vsel %vm251_vm9, %v258_v52, %v243_v3  ;;  %vm332_vm15 = vcmp.eq.s32.totalorder %v152_v2, 7  ;;  %vm359_vm0 = vcmp.eq.s32.totalorder %v152_v2, 8 }
  0x44   :  { %v350_v10 = vsel %vm331_vm10, %v338_v31, %v323_v5  ;;  %v297_v14 = vsel %vm278_vm11, %v285_v53, %v270_v6 }
  0x45   :  { %v377_v20 = vsel %vm358_vm12, %v365_v32, %v350_v10  ;;  %v324_v18 = vsel %vm305_vm14, %v312_v55, %v297_v14 }
  0x46   :  { %385 = vst [vmem:[#allocation7 + $0x30] sm:$0xf] %v377_v20  ;;  %v351_v24 = vsel %vm332_vm15, %v339_v56, %v324_v18 }
  0x47   :  { %v378_v27 = vsel %vm359_vm0, %v366_v40, %v351_v24 }
  0x48   :  { %386 = vst [vmem:[#allocation7 + $0x38] sm:$0xf] %v378_v27 }
  0x49   :  { %399 = dma.vmem_to_hbm [thread:$0]  %s392_s1, 1024, %s394_s23, [#allocation4], %s494_s17, %s494_s17, %s495_s18  }
  0x4a   :  { %491 = dma.done.wait [#allocation4], 1024  }
  0x4b   :  { %492 = vsyncadd [#allocation4], 4294966272 }
  0x4c   :  { %404 = vsyncpa [#allocation3], 1 }
  0x4d   :  { %405 = vsyncpa [#allocation6], 1 }
  0x4e   :  { %406 = vsyncpa [#allocation4], 1 }

</bundles_post_ra>
